<compile_context>
chip_gen: v7x
topology: tpu7x:2x2x1
jax: 0.10.0
libtpu: 0.0.40
codegen_flags: <defaults>
</compile_context>

<pallas_src>
import functools

import jax
import jax.numpy as jnp
from jax.experimental import pallas as pl
from jax.experimental.pallas import tpu as pltpu


def _round_up(n: int, m: int) -> int:
    return ((n + m - 1) // m) * m


def tiny_mlp_kernel(x_ref, w1_ref, b1_ref, w2_ref, b2_ref, o_ref):
    # x_ref/w1_ref are bf16; accumulate on the MXU in f32.
    h = jnp.dot(x_ref[...], w1_ref[...],
                preferred_element_type=jnp.float32) + b1_ref[...]   # (TB, 128) f32
    h = jnp.maximum(h, 0.0)                                          # ReLU (f32 on VPU)
    y = jnp.dot(h, w2_ref[...],
                preferred_element_type=jnp.float32) + b2_ref[...]   # (TB, 128) f32
    o_ref[...] = y.astype(o_ref.dtype)


@functools.partial(jax.jit, static_argnames=("tb",))
def tiny_model_forward(x, w1_t, b1, w2_t, b2, *, tb=256):
    """x: (B, 1000); w1_t: (1000, 100); b1: (100,); w2_t: (100, 10); b2: (10,)."""
    B, d_in = x.shape
    d_hid = w1_t.shape[1]
    d_out = w2_t.shape[1]

    # Lane/MXU-aligned padded feature dims.
    d_in_p = _round_up(d_in, 128)    # 1000 -> 1024
    d_hid_p = _round_up(d_hid, 128)  # 100  -> 128
    d_out_p = _round_up(d_out, 128)  # 10   -> 128

    # Batch tile: multiple of 8 sublanes, capped at `tb` rows (keeps the x/out
    # double-buffers small even on v7x's 64 MiB VMEM / v5e's 16 MiB default).
    tb_eff = min(_round_up(tb, 8), _round_up(B, 8))
    b_pad = _round_up(B, tb_eff)
    grid = (pl.cdiv(b_pad, tb_eff),)

    # Host-side zero-padding (zeros keep the extra hidden/output columns exactly
    # zero, so slicing [:, :d_out] matches the unpadded math) + bf16 cast of the
    # traffic-dominant operands (x, w1).
    x_bf = jnp.pad(x, ((0, b_pad - B), (0, d_in_p - d_in))).astype(jnp.bfloat16)
    w1_bf = jnp.pad(w1_t, ((0, d_in_p - d_in), (0, d_hid_p - d_hid))).astype(jnp.bfloat16)
    b1_p = jnp.pad(b1, (0, d_hid_p - d_hid)).reshape(1, d_hid_p).astype(jnp.float32)
    w2_p = jnp.pad(w2_t, ((0, d_hid_p - d_hid), (0, d_out_p - d_out))).astype(jnp.float32)
    b2_p = jnp.pad(b2, (0, d_out_p - d_out)).reshape(1, d_out_p).astype(jnp.float32)

    flops = 2 * b_pad * d_in_p * d_hid_p + 2 * b_pad * d_hid_p * d_out_p
    bytes_accessed = (x_bf.size * 2 + w1_bf.size * 2 + b1_p.size * 4
                      + w2_p.size * 4 + b2_p.size * 4 + b_pad * d_out_p * 4)

    out = pl.pallas_call(
        tiny_mlp_kernel,
        out_shape=jax.ShapeDtypeStruct((b_pad, d_out_p), jnp.float32),
        grid=grid,
        in_specs=[
            # Batch-tiled activations.
            pl.BlockSpec((tb_eff, d_in_p), lambda i: (i, 0)),
            # Weights/biases: constant block index -> loaded once, stay in VMEM.
            pl.BlockSpec((d_in_p, d_hid_p), lambda i: (0, 0)),
            pl.BlockSpec((1, d_hid_p), lambda i: (0, 0)),
            pl.BlockSpec((d_hid_p, d_out_p), lambda i: (0, 0)),
            pl.BlockSpec((1, d_out_p), lambda i: (0, 0)),
        ],
        out_specs=pl.BlockSpec((tb_eff, d_out_p), lambda i: (i, 0)),
        compiler_params=pltpu.CompilerParams(
            dimension_semantics=("parallel",)),
        cost_estimate=pl.CostEstimate(
            flops=flops, transcendentals=0, bytes_accessed=bytes_accessed),
    )(x_bf, w1_bf, b1_p, w2_p, b2_p)

    # Strip batch/feature padding.
    return out[:B, :d_out]


def reference_forward_bf16(x, w1_t, b1, w2_t, b2):
    # Mirrors the kernel's precision choices (bf16 first matmul, f32 accum/rest).
    h = jnp.dot(x.astype(jnp.bfloat16), w1_t.astype(jnp.bfloat16),
                preferred_element_type=jnp.float32) + b1
    h = jnp.maximum(h, 0.0)
    return jnp.dot(h, w2_t, preferred_element_type=jnp.float32) + b2


def reference_forward_f32(x, w1_t, b1, w2_t, b2):
    h = jnp.maximum(x @ w1_t + b1, 0.0)
    return h @ w2_t + b2


if __name__ == "__main__":
    key = jax.random.PRNGKey(0)
    k_x, k_w1, k_b1, k_w2, k_b2 = jax.random.split(key, 5)

    B, D_IN, D_HID, D_OUT = 8, 1000, 100, 10

    # Deterministic synthetic parameters (PyTorch shapes: W1 (100,1000),
    # W2 (10,100)), stored pre-transposed as (in, out) for the kernel.
    x = jax.random.normal(k_x, (B, D_IN), dtype=jnp.float32)
    w1_t = jax.random.normal(k_w1, (D_IN, D_HID), dtype=jnp.float32) * 0.03
    b1 = jax.random.normal(k_b1, (D_HID,), dtype=jnp.float32) * 0.01
    w2_t = jax.random.normal(k_w2, (D_HID, D_OUT), dtype=jnp.float32) * 0.1
    b2 = jax.random.normal(k_b2, (D_OUT,), dtype=jnp.float32) * 0.01

    out = tiny_model_forward(x, w1_t, b1, w2_t, b2)
    out = jax.block_until_ready(out)
    assert out.shape == (B, D_OUT), out.shape

    # Tight check vs a precision-matched (bf16 first matmul) reference.
    ref_bf16 = reference_forward_bf16(x, w1_t, b1, w2_t, b2)
    assert jnp.allclose(out, ref_bf16, atol=2e-3, rtol=2e-3), "mismatch vs bf16 reference"

    # Loose sanity check vs the full-f32 PyTorch-equivalent math.
    ref_f32 = reference_forward_f32(x, w1_t, b1, w2_t, b2)
    assert jnp.allclose(out, ref_f32, atol=1e-1, rtol=1e-1), "mismatch vs f32 reference"

    print("KERNEL_OK")
</pallas_src>

<mosaic_0001>
module attributes {stable_mosaic.version = 11 : i64} {
  func.func @tiny_mlp_kernel(%arg0: i32, %arg1: memref<8x1024xbf16, #tpu.memory_space<vmem>>, %arg2: memref<1024x128xbf16, #tpu.memory_space<vmem>>, %arg3: memref<1x128xf32, #tpu.memory_space<vmem>>, %arg4: memref<128x128xf32, #tpu.memory_space<vmem>>, %arg5: memref<1x128xf32, #tpu.memory_space<vmem>>, %arg6: memref<8x128xf32, #tpu.memory_space<vmem>>) attributes {dimension_semantics = [#tpu.dimension_semantics<parallel>], iteration_bounds = array<i64: 1>, scalar_prefetch = 0 : i64, scratch_operands = 0 : i64, tpu.core_type = #tpu.core_type<tc>, window_params = [{transform_indices = @transform_0, window_bounds = array<i64: 8, 1024>}, {pipeline_mode = #tpu.pipeline_mode<synchronous>, transform_indices = @transform_1, window_bounds = array<i64: 1024, 128>}, {pipeline_mode = #tpu.pipeline_mode<synchronous>, transform_indices = @transform_2, window_bounds = array<i64: 1, 128>}, {pipeline_mode = #tpu.pipeline_mode<synchronous>, transform_indices = @transform_3, window_bounds = array<i64: 128, 128>}, {pipeline_mode = #tpu.pipeline_mode<synchronous>, transform_indices = @transform_4, window_bounds = array<i64: 1, 128>}, {transform_indices = @transform_5, window_bounds = array<i64: 8, 128>}]} {
    %c0 = arith.constant 0 : index
    %c0_0 = arith.constant 0 : index
    %0 = vector.load %arg1[%c0, %c0_0] : memref<8x1024xbf16, #tpu.memory_space<vmem>>, vector<8x1024xbf16>
    %c0_1 = arith.constant 0 : index
    %c0_2 = arith.constant 0 : index
    %1 = vector.load %arg2[%c0_1, %c0_2] : memref<1024x128xbf16, #tpu.memory_space<vmem>>, vector<1024x128xbf16>
    %cst = arith.constant dense<0.000000e+00> : vector<8x128xf32>
    %2 = tpu.matmul %0, %1, %cst {dimension_numbers = #tpu.dot_dimension_numbers<[1], [0], [0], [1], [0, 0, 1, 1], [], []>} : vector<8x1024xbf16>, vector<1024x128xbf16>, vector<8x128xf32> -> vector<8x128xf32>
    %c0_3 = arith.constant 0 : index
    %c0_4 = arith.constant 0 : index
    %3 = vector.load %arg3[%c0_3, %c0_4] : memref<1x128xf32, #tpu.memory_space<vmem>>, vector<1x128xf32>
    %4 = vector.broadcast %3 : vector<1x128xf32> to vector<8x128xf32>
    %5 = arith.addf %2, %4 : vector<8x128xf32>
    %cst_5 = arith.constant 0.000000e+00 : f32
    %6 = vector.broadcast %cst_5 : f32 to vector<8x128xf32>
    %7 = arith.maximumf %5, %6 : vector<8x128xf32>
    %c0_6 = arith.constant 0 : index
    %c0_7 = arith.constant 0 : index
    %8 = vector.load %arg4[%c0_6, %c0_7] : memref<128x128xf32, #tpu.memory_space<vmem>>, vector<128x128xf32>
    %cst_8 = arith.constant dense<0.000000e+00> : vector<8x128xf32>
    %9 = tpu.matmul %7, %8, %cst_8 {dimension_numbers = #tpu.dot_dimension_numbers<[1], [0], [0], [1], [0, 0, 1, 1], [], []>} : vector<8x128xf32>, vector<128x128xf32>, vector<8x128xf32> -> vector<8x128xf32>
    %c0_9 = arith.constant 0 : index
    %c0_10 = arith.constant 0 : index
    %10 = vector.load %arg5[%c0_9, %c0_10] : memref<1x128xf32, #tpu.memory_space<vmem>>, vector<1x128xf32>
    %11 = vector.broadcast %10 : vector<1x128xf32> to vector<8x128xf32>
    %12 = arith.addf %9, %11 : vector<8x128xf32>
    %c0_11 = arith.constant 0 : index
    %c0_12 = arith.constant 0 : index
    %13 = vector.load %arg6[%c0_11, %c0_12] : memref<8x128xf32, #tpu.memory_space<vmem>>, vector<8x128xf32>
    tpu.vector_store %arg6[%c0_11, %c0_12], %12 {strides = array<i32>} : memref<8x128xf32, #tpu.memory_space<vmem>>, vector<8x128xf32>,
    return
  }
  func.func @transform_0(%arg0: i32) -> (i32, i32) {
    %c0_i32 = arith.constant 0 : i32
    %c0_i32_0 = arith.constant 0 : i32
    return %arg0, %c0_i32 : i32, i32
  }
  func.func @transform_1(%arg0: i32) -> (i32, i32) {
    %c0_i32 = arith.constant 0 : i32
    %c0_i32_0 = arith.constant 0 : i32
    %c0_i32_1 = arith.constant 0 : i32
    return %c0_i32, %c0_i32_0 : i32, i32
  }
  func.func @transform_2(%arg0: i32) -> (i32, i32) {
    %c0_i32 = arith.constant 0 : i32
    %c0_i32_0 = arith.constant 0 : i32
    %c0_i32_1 = arith.constant 0 : i32
    return %c0_i32, %c0_i32_0 : i32, i32
  }
  func.func @transform_3(%arg0: i32) -> (i32, i32) {
    %c0_i32 = arith.constant 0 : i32
    %c0_i32_0 = arith.constant 0 : i32
    %c0_i32_1 = arith.constant 0 : i32
    return %c0_i32, %c0_i32_0 : i32, i32
  }
  func.func @transform_4(%arg0: i32) -> (i32, i32) {
    %c0_i32 = arith.constant 0 : i32
    %c0_i32_0 = arith.constant 0 : i32
    %c0_i32_1 = arith.constant 0 : i32
    return %c0_i32, %c0_i32_0 : i32, i32
  }
  func.func @transform_5(%arg0: i32) -> (i32, i32) {
    %c0_i32 = arith.constant 0 : i32
    %c0_i32_0 = arith.constant 0 : i32
    return %arg0, %c0_i32 : i32, i32
  }
}

</mosaic_0001>

<bundles_post_ra>
// kernel: tiny_model_forward.1
= control target key start
LH: loop header
LB: loop body
LE: loop exit
PB: predicated region body
PF: predicated region fallthrough
CT: control target
= control target key end

     0   :  { %s1484_s0 = inlined_call_operand.vmem [shape: bf16[8,1024], index: 0, kind: input, shape index: {}]   ;;  %s1485_s1 = inlined_call_operand.vmem [shape: bf16[1024,128], index: 1, kind: input, shape index: {}]   ;;  %s1486_s2 = inlined_call_operand.vmem [shape: f32[1,128], index: 2, kind: input, shape index: {}]   ;;  %s1487_s3 = inlined_call_operand.vmem [shape: f32[128,128], index: 3, kind: input, shape index: {}]   ;;  %s1488_s4 = inlined_call_operand.vmem [shape: f32[1,128], index: 4, kind: input, shape index: {}]   ;;  %s1489_s5 = inlined_call_operand.hbm [shape: f32[8,128], index: 5, kind: output, shape index: {}]  }
   0x1   :  { %v1084_v0 = vld [vmem:[%s1485_s1 + $0x40] sm:$0xff]   ;;  %v1088_v4 = vld [vmem:[%s1485_s1 + $0x48] sm:$0xff]   ;;  %v1092_v8 = vld [vmem:[%s1485_s1 + $0x50] sm:$0xff]  }
   0x2   :  { %v1085_v1 = vld [vmem:[%s1485_s1 + $0xc0] sm:$0xff]   ;;  %916 = vmatprep.subr.bf16.mxu0 %v1084_v0  ;;  %v1089_v5 = vld [vmem:[%s1485_s1 + $0xc8] sm:$0xff]   ;;  %v1093_v9 = vld [vmem:[%s1485_s1 + $0xd0] sm:$0xff]  }
   0x3   :  { %v1086_v2 = vld [vmem:[%s1485_s1] sm:$0xff]   ;;  %938 = vmatprep.subr.bf16.mxu1 %v1085_v1  ;;  %v1090_v6 = vld [vmem:[%s1485_s1 + $0x8] sm:$0xff]   ;;  %v1094_v10 = vld [vmem:[%s1485_s1 + $0x10] sm:$0xff]  }
   0x4   :  { %v1087_v3 = vld [vmem:[%s1485_s1 + $0x80] sm:$0xff]   ;;  %917 = vmatpush3.bf16.msra.mxu0 %v1086_v2  ;;  %v1091_v7 = vld [vmem:[%s1485_s1 + $0x88] sm:$0xff]   ;;  %v1095_v11 = vld [vmem:[%s1485_s1 + $0x90] sm:$0xff]  }
   0x5   :  { %939 = vmatpush3.bf16.msra.mxu1 %v1087_v3  ;;  %918 = vmatprep.subr.bf16.mxu0 %v1088_v4  ;;  %v1096_v12 = vld [vmem:[%s1485_s1 + $0x58] sm:$0xff]   ;;  %v1100_v16 = vld [vmem:[%s1485_s1 + $0x60] sm:$0xff]   ;;  %v1104_v20 = vld [vmem:[%s1485_s1 + $0x68] sm:$0xff]  }
   0x6   :  { %940 = vmatprep.subr.bf16.mxu1 %v1089_v5  ;;  %v1097_v13 = vld [vmem:[%s1485_s1 + $0xd8] sm:$0xff]   ;;  %v1101_v17 = vld [vmem:[%s1485_s1 + $0xe0] sm:$0xff]   ;;  %v1105_v21 = vld [vmem:[%s1485_s1 + $0xe8] sm:$0xff]  }
   0x7   :  { %v1098_v14 = vld [vmem:[%s1485_s1 + $0x18] sm:$0xff]   ;;  %v1102_v18 = vld [vmem:[%s1485_s1 + $0x20] sm:$0xff]   ;;  %v1106_v22 = vld [vmem:[%s1485_s1 + $0x28] sm:$0xff]  }
   0x8   :  { %919 = vmatpush3.bf16.msra.mxu0 %v1090_v6  ;;  %v1099_v15 = vld [vmem:[%s1485_s1 + $0x98] sm:$0xff]   ;;  %v1103_v19 = vld [vmem:[%s1485_s1 + $0xa0] sm:$0xff]   ;;  %v1107_v23 = vld [vmem:[%s1485_s1 + $0xa8] sm:$0xff]  }
   0x9   :  { %941 = vmatpush3.bf16.msra.mxu1 %v1091_v7  ;;  %920 = vmatprep.subr.bf16.mxu0 %v1092_v8  ;;  %v1108_v24 = vld [vmem:[%s1485_s1 + $0x70] sm:$0xff]   ;;  %v1112_v28 = vld [vmem:[%s1485_s1 + $0x78] sm:$0xff]   ;;  %v22_v32 = vld [vmem:[%s1484_s0] sm:$0xff] }
   0xa   :  { %942 = vmatprep.subr.bf16.mxu1 %v1093_v9  ;;  %v1109_v25 = vld [vmem:[%s1485_s1 + $0xf0] sm:$0xff]   ;;  %v1113_v29 = vld [vmem:[%s1485_s1 + $0xf8] sm:$0xff]   ;;  %v23_v33 = vld [vmem:[%s1484_s0 + $0x8] sm:$0xff]  ;;  %v843_v34 = vcombine.low %v22_v32, %v22_v32  ;;  %v844_v35 = vcombine.high %v22_v32, %v22_v32 }
   0xb   :  { %v1110_v26 = vld [vmem:[%s1485_s1 + $0x30] sm:$0xff]   ;;  %v1114_v30 = vld [vmem:[%s1485_s1 + $0x38] sm:$0xff]   ;;  %v845_v36 = vcombine.low %v23_v33, %v23_v33  ;;  %v846_v37 = vcombine.high %v23_v33, %v23_v33  ;;  %v1120_v38 = vld [vmem:[%s1485_s1 + $0x140] sm:$0xff]  }
   0xc   :  { %921 = vmatpush3.bf16.msra.mxu0 %v1094_v10  ;;  %v1111_v27 = vld [vmem:[%s1485_s1 + $0xb0] sm:$0xff]   ;;  %v1115_v31 = vld [vmem:[%s1485_s1 + $0xb8] sm:$0xff]   ;;  %v1121_v39 = vld [vmem:[%s1485_s1 + $0x1c0] sm:$0xff]   ;;  %605 = vmatprep.mubr.bf16.mxu0 %v844_v35 }
   0xd   :  { %943 = vmatpush3.bf16.msra.mxu1 %v1095_v11  ;;  %922 = vmatprep.subr.bf16.mxu0 %v1096_v12  ;;  %v1122_v40 = vld [vmem:[%s1485_s1 + $0x100] sm:$0xff]   ;;  %v1124_v42 = vld [vmem:[%s1485_s1 + $0x148] sm:$0xff]   ;;  %v1128_v46 = vld [vmem:[%s1485_s1 + $0x150] sm:$0xff]  }
   0xe   :  { %944 = vmatprep.subr.bf16.mxu1 %v1097_v13  ;;  %645 = vmatprep.mubr.bf16.mxu1 %v846_v37  ;;  %v1123_v41 = vld [vmem:[%s1485_s1 + $0x180] sm:$0xff]   ;;  %v1125_v43 = vld [vmem:[%s1485_s1 + $0x1c8] sm:$0xff]   ;;  %v1129_v47 = vld [vmem:[%s1485_s1 + $0x1d0] sm:$0xff]  }
   0xf   :  { %v1126_v44 = vld [vmem:[%s1485_s1 + $0x108] sm:$0xff]   ;;  %v1130_v48 = vld [vmem:[%s1485_s1 + $0x110] sm:$0xff]   ;;  %v1132_v50 = vld [vmem:[%s1485_s1 + $0x158] sm:$0xff]  }
  0x10   :  { %923 = vmatpush3.bf16.msra.mxu0 %v1098_v14  ;;  %v1127_v45 = vld [vmem:[%s1485_s1 + $0x188] sm:$0xff]   ;;  %v1131_v49 = vld [vmem:[%s1485_s1 + $0x190] sm:$0xff]   ;;  %v1133_v51 = vld [vmem:[%s1485_s1 + $0x1d8] sm:$0xff]  }
  0x11   :  { %945 = vmatpush3.bf16.msra.mxu1 %v1099_v15  ;;  %924 = vmatprep.subr.bf16.mxu0 %v1100_v16  ;;  %v1134_v52 = vld [vmem:[%s1485_s1 + $0x118] sm:$0xff]   ;;  %v1136_v54 = vld [vmem:[%s1485_s1 + $0x160] sm:$0xff]   ;;  %v1140_v58 = vld [vmem:[%s1485_s1 + $0x168] sm:$0xff]  }
  0x12   :  { %946 = vmatprep.subr.bf16.mxu1 %v1101_v17  ;;  %v1135_v53 = vld [vmem:[%s1485_s1 + $0x198] sm:$0xff]   ;;  %v1137_v55 = vld [vmem:[%s1485_s1 + $0x1e0] sm:$0xff]   ;;  %v1141_v59 = vld [vmem:[%s1485_s1 + $0x1e8] sm:$0xff]  }
  0x13   :  { %v1138_v56 = vld [vmem:[%s1485_s1 + $0x120] sm:$0xff]   ;;  %v1142_v60 = vld [vmem:[%s1485_s1 + $0x128] sm:$0xff]   ;;  %v1144_v62 = vld [vmem:[%s1485_s1 + $0x170] sm:$0xff]  }
  0x14   :  { %925 = vmatpush3.bf16.msra.mxu0 %v1102_v18  ;;  %v1139_v57 = vld [vmem:[%s1485_s1 + $0x1a0] sm:$0xff]   ;;  %v1143_v61 = vld [vmem:[%s1485_s1 + $0x1a8] sm:$0xff]   ;;  %v1145_v63 = vld [vmem:[%s1485_s1 + $0x1f0] sm:$0xff]  }
  0x15   :  { %947 = vmatpush3.bf16.msra.mxu1 %v1103_v19  ;;  %926 = vmatprep.subr.bf16.mxu0 %v1104_v20  ;;  %v1146_v0 = vld [vmem:[%s1485_s1 + $0x130] sm:$0xff]   ;;  %v1148_v2 = vld [vmem:[%s1485_s1 + $0x178] sm:$0xff]  }
  0x16   :  { %948 = vmatprep.subr.bf16.mxu1 %v1105_v21  ;;  %v1147_v1 = vld [vmem:[%s1485_s1 + $0x1b0] sm:$0xff]   ;;  %v1149_v3 = vld [vmem:[%s1485_s1 + $0x1f8] sm:$0xff]  }
  0x17   :  { %v1150_v4 = vld [vmem:[%s1485_s1 + $0x138] sm:$0xff]   ;;  %v24_v6 = vld [vmem:[%s1484_s0 + $0x10] sm:$0xff] }
  0x18   :  { %927 = vmatpush3.bf16.msra.mxu0 %v1106_v22  ;;  %v1151_v5 = vld [vmem:[%s1485_s1 + $0x1b8] sm:$0xff]   ;;  %v847_v7 = vcombine.low %v24_v6, %v24_v6  ;;  %v848_v8 = vcombine.high %v24_v6, %v24_v6 }
  0x19   :  { %949 = vmatpush3.bf16.msra.mxu1 %v1107_v23  ;;  %928 = vmatprep.subr.bf16.mxu0 %v1108_v24  ;;  %v25_v9 = vld [vmem:[%s1484_s0 + $0x18] sm:$0xff] }
  0x1a   :  { %950 = vmatprep.subr.bf16.mxu1 %v1109_v25 }
  0x1c   :  { %929 = vmatpush3.bf16.msra.mxu0 %v1110_v26 }
  0x1d   :  { %951 = vmatpush3.bf16.msra.mxu1 %v1111_v27  ;;  %930 = vmatprep.subr.bf16.mxu0 %v1112_v28 }
  0x1e   :  { %952 = vmatprep.subr.bf16.mxu1 %v1113_v29 }
  0x20   :  { %931 = vmatpush3.bf16.msra.mxu0 %v1114_v30 }
  0x21   :  { %953 = vmatpush3.bf16.msra.mxu1 %v1115_v31  ;;  %960 = vmatprep.subr.bf16.mxu0 %v1120_v38 }
  0x22   :  { %982 = vmatprep.subr.bf16.mxu1 %v1121_v39 }
  0x23   :  { %606 = vmatmul.mubr.bf16.vlgmr.msra.gmra.mrb[0].mxu0 %v843_v34 }
  0x24   :  { %646 = vmatmul.mubr.bf16.vlgmr.msra.gmra.mrb[0].mxu1 %v845_v36  ;;  %961 = vmatpush3.bf16.msra.mxu0 %v1122_v40 }
  0x25   :  { %983 = vmatpush3.bf16.msra.mxu1 %v1123_v41  ;;  %962 = vmatprep.subr.bf16.mxu0 %v1124_v42 }
  0x26   :  { %984 = vmatprep.subr.bf16.mxu1 %v1125_v43 }
  0x28   :  { %963 = vmatpush3.bf16.msra.mxu0 %v1126_v44 }
  0x29   :  { %985 = vmatpush3.bf16.msra.mxu1 %v1127_v45  ;;  %964 = vmatprep.subr.bf16.mxu0 %v1128_v46 }
  0x2a   :  { %986 = vmatprep.subr.bf16.mxu1 %v1129_v47 }
  0x2c   :  { %965 = vmatpush3.bf16.msra.mxu0 %v1130_v48 }
  0x2d   :  { %987 = vmatpush3.bf16.msra.mxu1 %v1131_v49  ;;  %966 = vmatprep.subr.bf16.mxu0 %v1132_v50 }
  0x2e   :  { %988 = vmatprep.subr.bf16.mxu1 %v1133_v51 }
  0x30   :  { %967 = vmatpush3.bf16.msra.mxu0 %v1134_v52 }
  0x31   :  { %989 = vmatpush3.bf16.msra.mxu1 %v1135_v53  ;;  %968 = vmatprep.subr.bf16.mxu0 %v1136_v54 }
  0x32   :  { %990 = vmatprep.subr.bf16.mxu1 %v1137_v55 }
  0x34   :  { %969 = vmatpush3.bf16.msra.mxu0 %v1138_v56 }
  0x35   :  { %991 = vmatpush3.bf16.msra.mxu1 %v1139_v57  ;;  %970 = vmatprep.subr.bf16.mxu0 %v1140_v58 }
  0x36   :  { %992 = vmatprep.subr.bf16.mxu1 %v1141_v59 }
  0x38   :  { %971 = vmatpush3.bf16.msra.mxu0 %v1142_v60 }
  0x39   :  { %993 = vmatpush3.bf16.msra.mxu1 %v1143_v61  ;;  %972 = vmatprep.subr.bf16.mxu0 %v1144_v62 }
  0x3a   :  { %994 = vmatprep.subr.bf16.mxu1 %v1145_v63 }
  0x3c   :  { %973 = vmatpush3.bf16.msra.mxu0 %v1146_v0 }
  0x3d   :  { %995 = vmatpush3.bf16.msra.mxu1 %v1147_v1  ;;  %974 = vmatprep.subr.bf16.mxu0 %v1148_v2 }
  0x3e   :  { %996 = vmatprep.subr.bf16.mxu1 %v1149_v3 }
  0x3f   :  { %10 = vsyncpa [#allocation3], 0  ;;  %v849_v10 = vcombine.low %v25_v9, %v25_v9  ;;  %v850_v11 = vcombine.high %v25_v9, %v25_v9  ;;  %685 = vmatprep.mubr.bf16.mxu0 %v848_v8  ;;  %v734_v12 = vld [vmem:[%s1487_s3] sm:$0xff]  ;;  %v735_v13 = vld [vmem:[%s1487_s3 + $0x8] sm:$0xff]  ;;  %v1180_v15 = vmov 0.0|0.0   ;;  %vm1181_vm0 = vmmov 0  }
  0x40   :  { %975 = vmatpush3.bf16.msra.mxu0 %v1150_v4  ;;  %v736_v14 = vld [vmem:[%s1487_s3 + $0x10] sm:$0xff]  ;;  %v1057_v16 = vpack.c.bf16 %v735_v13, %v734_v12  ;;  %v737_v17 = vld [vmem:[%s1487_s3 + $0x18] sm:$0xff]  ;;  %v738_v19 = vld [vmem:[%s1487_s3 + $0x20] sm:$0xff]  ;;  %v1182_v37 = vmov 0.0   ;;  %s1183_s9 = smov [#allocation2]  }
  0x41   :  { %997 = vmatpush3.bf16.msra.mxu1 %v1151_v5  ;;  %725 = vmatprep.mubr.bf16.mxu1 %v850_v11  ;;  %v1060_v18 = vpack.c.bf16 %v737_v17, %v736_v14  ;;  %v739_v20 = vld [vmem:[%s1487_s3 + $0x28] sm:$0xff]  ;;  %v740_v22 = vld [vmem:[%s1487_s3 + $0x30] sm:$0xff]  ;;  %v741_v23 = vld [vmem:[%s1487_s3 + $0x38] sm:$0xff]  ;;  %s834_s10 = sshll.u32 %s1183_s9, 4  ;;  %s835_s10 = int_to_ptr.vmem [resolvable:$true] %s834_s10 }
  0x42   :  { %1056 = vmatprep.subr.bf16.mxu0 %v1180_v15  ;;  %v1063_v21 = vpack.c.bf16 %v739_v20, %v738_v19  ;;  %v1066_v24 = vpack.c.bf16 %v741_v23, %v740_v22  ;;  %v742_v25 = vld [vmem:[%s1487_s3 + $0x40] sm:$0xff]  ;;  %v743_v26 = vld [vmem:[%s1487_s3 + $0x48] sm:$0xff]  ;;  %v744_v28 = vld [vmem:[%s1487_s3 + $0x50] sm:$0xff]  ;;  %s1156_s11 = scalar_lea.vmem %s835_s10, 128  ;;  %p1161_p1 = scmp.lt.s32.totalorder %s835_s10, %s835_s10 }
  0x43   :  { %686 = vmatmul.mubr.bf16.vlgmr.msra.gmra.mrb[4].mxu0 %v847_v7  ;;  %v1069_v27 = vpack.c.bf16 %v743_v26, %v742_v25  ;;  %v745_v29 = vld [vmem:[%s1487_s3 + $0x58] sm:$0xff]  ;;  %v746_v31 = vld [vmem:[%s1487_s3 + $0x60] sm:$0xff]  ;;  %v747_v32 = vld [vmem:[%s1487_s3 + $0x68] sm:$0xff]  ;;  %p1157_p0 = scmp.ne.s32.totalorder %s835_s10, %s1156_s11  ;;  %p1162_p2 = scmp.lt.s32.totalorder %s1156_s11, %s1156_s11 }
  0x44   :  { %726 = vmatmul.mubr.bf16.vlgmr.msra.gmra.mrb[4].mxu1 %v849_v10  ;;  %1058 = vmatpush3.bf16.msra.mxu0 %v1057_v16  ;;  %v1072_v30 = vpack.c.bf16 %v745_v29, %v744_v28  ;;  %v1075_v33 = vpack.c.bf16 %v747_v32, %v746_v31  ;;  %v748_v34 = vld [vmem:[%s1487_s3 + $0x70] sm:$0xff]  ;;  %v749_v35 = vld [vmem:[%s1487_s3 + $0x78] sm:$0xff]  ;;  %v842_v40 = vld [vmem:[%s1486_s2] ss:$0 sm:$0xff] }
  0x45   :  { %1059 = vmatprep.subr.bf16.mxu0 %v1180_v15  ;;  %v1078_v36 = vpack.c.bf16 %v749_v35, %v748_v34  ;;  %1053 = vmatprep.mubr.msk.f32.mxu0 %vm1181_vm0, %v1182_v37  ;;  %v915_v0 = vld [vmem:[%s1488_s4] ss:$0 sm:$0xff]  ;;  %p1163_p3 = por %p1162_p2, %p1161_p1 }
  0x47   :  { %p1164_p4 = pnand %p1163_p3, %p1157_p0 }
  0x48   :  { %1061 = vmatpush3.bf16.msra.mxu0 %v1060_v18 }
  0x49   :  { %1062 = vmatprep.subr.bf16.mxu0 %v1180_v15 }
  0x4c   :  { %1064 = vmatpush3.bf16.msra.mxu0 %v1063_v21 }
  0x4d   :  { %1065 = vmatprep.subr.bf16.mxu0 %v1180_v15 }
  0x50   :  { %1067 = vmatpush3.bf16.msra.mxu0 %v1066_v24 }
  0x51   :  { %1068 = vmatprep.subr.bf16.mxu0 %v1180_v15 }
  0x54   :  { %1070 = vmatpush3.bf16.msra.mxu0 %v1069_v27 }
  0x55   :  { %1071 = vmatprep.subr.bf16.mxu0 %v1180_v15 }
  0x58   :  { %1073 = vmatpush3.bf16.msra.mxu0 %v1072_v30 }
  0x59   :  { %1074 = vmatprep.subr.bf16.mxu0 %v1180_v15 }
  0x5c   :  { %1076 = vmatpush3.bf16.msra.mxu0 %v1075_v33 }
  0x5d   :  { %1077 = vmatprep.subr.bf16.mxu0 %v1180_v15 }
  0x60   :  { %1079 = vmatpush3.bf16.msra.mxu0 %v1078_v36 }
  0xf6   :  { %v932_v38 = vpop.f32.mrb[0].mxu0 }
  0xf7   :  { %v954_v39 = vpop.f32.mrb[0].mxu1  ;;  %v933_v41 = vpop.f32.mrb[1].mxu0 }
  0xf8   :  { %v955_v42 = vpop.f32.mrb[1].mxu1  ;;  %v934_v43 = vadd.f32 %v933_v41, %v932_v38  ;;  %v935_v45 = vpop.f32.mrb[2].mxu0 }
  0xf9   :  { %v956_v44 = vadd.f32 %v955_v42, %v954_v39  ;;  %v957_v46 = vpop.f32.mrb[2].mxu1  ;;  %v936_v47 = vpop.f32.mrb[3].mxu0 }
  0xfa   :  { %v958_v48 = vpop.f32.mrb[3].mxu1  ;;  %v608_v49 = vadd.f32 %v934_v43, %v842_v40 }
  0xfc   :  { %v648_v50 = vadd.f32 %v956_v44, %v608_v49 }
 0x116   :  { %v976_v51 = vpop.f32.mrb[4].mxu0 }
 0x117   :  { %v998_v52 = vpop.f32.mrb[4].mxu1  ;;  %v977_v53 = vpop.f32.mrb[5].mxu0 }
 0x118   :  { %v999_v54 = vpop.f32.mrb[5].mxu1  ;;  %v978_v55 = vadd.f32 %v977_v53, %v976_v51  ;;  %v979_v57 = vpop.f32.mrb[6].mxu0 }
 0x119   :  { %v1000_v56 = vadd.f32 %v999_v54, %v998_v52  ;;  %v1001_v58 = vpop.f32.mrb[6].mxu1  ;;  %v980_v59 = vpop.f32.mrb[7].mxu0 }
 0x11a   :  { %v1002_v60 = vpop.f32.mrb[7].mxu1  ;;  %v688_v61 = vadd.f32 %v978_v55, %v648_v50 }
 0x11c   :  { %v728_v62 = vadd.f32 %v1000_v56, %v688_v61 }
 0x11e   :  { %v733_v63 = vmax.f32 %v728_v62, 0.0 }
 0x120   :  { %1054 = vmatmul.mubr.f32.vlgmr.msra.gmra.mrb[8].mxu0 %v733_v63 }
 0x1f3   :  { %v823_v1 = vpop.f32.mrb[8].mxu0 }
 0x1f4   :  { %v824_v2 = vadd.f32 %v915_v0, %v823_v1  ;;  %v1055_v3 = vpop.f32.mrb[9].mxu0 }
 0x1f6   :  { %827 = vst [vmem:[#allocation2] sm:$0xff] %v824_v2 }
 0x1f7   :  { %1167 = shalt.err (!%p1164_p4)
}
 0x1f8   :  { %s1168_s14 = scalar_lea.hbm %s1489_s5, 128 }
 0x1f9   :  { %p1169_p5 = scmp.ne.s32.totalorder %s1489_s5, %s1168_s14  ;;  %p1172_p6 = scmp.lt.u32.totalorder %s1168_s14, %s1489_s5 }
 0x1fb   :  { %p1174_p7 = pnand %p1172_p6, %p1169_p5 }
 0x1fd   :  { %1177 = shalt.err (!%p1174_p7)
}
 0x1fe   :  { %837 = dma.vmem_to_hbm [thread:$0]  %s835_s10, 128, %s1489_s5, [#allocation3]  }
 0x1ff   :  { %1178 = dma.done.wait [#allocation3], 128  }
 0x200   :  { %1179 = vsyncadd [#allocation3], 4294967168 }
 0x201   :  { %841 = vsyncpa [#allocation3], 1 }

</bundles_post_ra>
